<compile_context>
chip_gen: v6e
topology: v6e:2x2x1
jax: 0.10.0
libtpu: 0.0.40
codegen_flags: <defaults>
</compile_context>

<pallas_src>
import math
import jax
import jax.numpy as jnp
from jax.experimental import pallas as pl
from jax.experimental.pallas import tpu as pltpu  # noqa: F401  (TPU backend)

D_MODEL = 32
N_HEADS = 4
D_K = D_MODEL // N_HEADS
D_FF = 4 * D_MODEL
SEQ = 8
BATCH = 2
EPS = 1e-5


def _layer_norm(h, gamma, beta):
    mu = jnp.mean(h, axis=-1, keepdims=True)
    var = jnp.mean((h - mu) ** 2, axis=-1, keepdims=True)
    return (h - mu) * jax.lax.rsqrt(var + EPS) * gamma + beta


def transformer_block_kernel(
    x_ref,
    wqkv_ref, bqkv_ref,      # fused pre-transposed QKV: (D, 3D), (1, 3D)
    wo_ref, bo_ref,          # pre-transposed out proj:  (D, D),  (1, D)
    g1_ref, be1_ref,
    w1_ref, b1_ref,          # pre-transposed FFN 1:     (D, 4D), (1, 4D)
    w2_ref, b2_ref,          # pre-transposed FFN 2:     (4D, D), (1, D)
    g2_ref, be2_ref,
    o_ref,
):
    B, S, D = x_ref.shape
    x = x_ref[...]                                            # (B, S, D) f32

    # ---- Fused Q/K/V projection: one wide matmul (batched over B). ----
    wqkv = jnp.broadcast_to(wqkv_ref[...], (B, D, 3 * D))
    qkv = jnp.einsum('bsd,bdf->bsf', x, wqkv,
                     preferred_element_type=jnp.float32) + bqkv_ref[...]
    q = qkv[:, :, 0 * D:1 * D]
    k = qkv[:, :, 1 * D:2 * D]
    v = qkv[:, :, 2 * D:3 * D]

    # ---- Multi-head scaled dot-product attention (mask=None path). ----
    # Output projection is fused into the head loop (no lane-dim concat):
    # sum_h head_h @ Wo^T[h*dk:(h+1)*dk, :]
    scale = 1.0 / math.sqrt(D_K)
    wo_b = jnp.broadcast_to(wo_ref[...], (B, D, D))           # hoisted broadcast
    attn_out = bo_ref[...]                                    # (1, D), broadcasts
    for h in range(N_HEADS):
        sl = slice(h * D_K, (h + 1) * D_K)
        qh, kh, vh = q[:, :, sl], k[:, :, sl], v[:, :, sl]
        scores = jnp.einsum('bqd,bkd->bqk', qh, kh,
                            preferred_element_type=jnp.float32) * scale
        scores = scores - jnp.max(scores, axis=-1, keepdims=True)
        e = jnp.exp(scores)
        p = e / jnp.sum(e, axis=-1, keepdims=True)
        aoh = jnp.einsum('bqk,bkd->bqd', p, vh,
                         preferred_element_type=jnp.float32)  # (B, S, d_k)
        attn_out = attn_out + jnp.einsum(
            'bsd,bde->bse', aoh, wo_b[:, sl, :],
            preferred_element_type=jnp.float32)

    # ---- Residual + LayerNorm1 (dropout = identity in eval). ----
    h1 = _layer_norm(x + attn_out, g1_ref[...], be1_ref[...])

    # ---- FFN: Linear(D, 4D) -> ReLU -> Linear(4D, D). ----
    w1 = jnp.broadcast_to(w1_ref[...], (B, D, D_FF))
    f = jnp.einsum('bsd,bdf->bsf', h1, w1,
                   preferred_element_type=jnp.float32) + b1_ref[...]
    f = jnp.maximum(f, 0.0)
    w2 = jnp.broadcast_to(w2_ref[...], (B, D_FF, D))
    ffn_out = jnp.einsum('bsf,bfd->bsd', f, w2,
                         preferred_element_type=jnp.float32) + b2_ref[...]

    # ---- Residual + LayerNorm2. ----
    out = _layer_norm(h1 + ffn_out, g2_ref[...], be2_ref[...])
    o_ref[...] = out.astype(o_ref.dtype)


@jax.jit
def transformer_block(x, params):
    (wq, bq, wk, bk, wv, bv, wo, bo,
     g1, be1, w1, b1, w2, b2, g2, be2) = params

    # Host-side weight prep (XLA-fused / const-foldable): pre-transpose every
    # weight and fuse Q/K/V so the kernel never transposes anything.
    wqkv_t = jnp.concatenate([wq.T, wk.T, wv.T], axis=1)      # (D, 3D)
    bqkv = jnp.concatenate([bq, bk, bv], axis=1)              # (1, 3D)
    wo_t, w1_t, w2_t = wo.T, w1.T, w2.T

    B, S, D = x.shape
    # Single invocation (no grid): every operand is a whole-array VMEM block.
    return pl.pallas_call(
        transformer_block_kernel,
        out_shape=jax.ShapeDtypeStruct((B, S, D), x.dtype),
    )(x, wqkv_t, bqkv, wo_t, bo, g1, be1, w1_t, b1, w2_t, b2, g2, be2)


def make_params(key):
    ks = jax.random.split(key, 8)

    def lin(k, out_dim, in_dim):
        kw, kb = jax.random.split(k)
        w = jax.random.normal(kw, (out_dim, in_dim), jnp.float32) * 0.05
        b = jax.random.normal(kb, (1, out_dim), jnp.float32) * 0.05
        return w, b

    wq, bq = lin(ks[0], D_MODEL, D_MODEL)
    wk, bk = lin(ks[1], D_MODEL, D_MODEL)
    wv, bv = lin(ks[2], D_MODEL, D_MODEL)
    wo, bo = lin(ks[3], D_MODEL, D_MODEL)
    w1, b1 = lin(ks[4], D_FF, D_MODEL)
    w2, b2 = lin(ks[5], D_MODEL, D_FF)
    g1 = jnp.ones((1, D_MODEL), jnp.float32)
    be1 = jnp.zeros((1, D_MODEL), jnp.float32)
    g2 = jnp.ones((1, D_MODEL), jnp.float32)
    be2 = jnp.zeros((1, D_MODEL), jnp.float32)
    return [wq, bq, wk, bk, wv, bv, wo, bo, g1, be1, w1, b1, w2, b2, g2, be2]


def reference(x, params):
    (wq, bq, wk, bk, wv, bv, wo, bo, g1, be1, w1, b1, w2, b2, g2, be2) = params
    B, S, D = x.shape

    def proj(y, w, b):
        return jnp.einsum('bsd,ed->bse', y, w) + b[0]

    q = proj(x, wq, bq).reshape(B, S, N_HEADS, D_K).transpose(0, 2, 1, 3)
    k = proj(x, wk, bk).reshape(B, S, N_HEADS, D_K).transpose(0, 2, 1, 3)
    v = proj(x, wv, bv).reshape(B, S, N_HEADS, D_K).transpose(0, 2, 1, 3)
    scores = jnp.einsum('bhqd,bhkd->bhqk', q, k) / math.sqrt(D_K)
    attn = jax.nn.softmax(scores, axis=-1)
    ao = jnp.einsum('bhqk,bhkd->bhqd', attn, v).transpose(0, 2, 1, 3).reshape(B, S, D)
    ao = proj(ao, wo, bo)

    def ln(h, g, b):
        mu = jnp.mean(h, -1, keepdims=True)
        var = jnp.mean((h - mu) ** 2, -1, keepdims=True)
        return (h - mu) / jnp.sqrt(var + EPS) * g[0] + b[0]

    h1 = ln(x + ao, g1, be1)
    f = jax.nn.relu(proj(h1, w1, b1))
    ffn = proj(f, w2, b2)
    return ln(h1 + ffn, g2, be2)


if __name__ == "__main__":
    key = jax.random.PRNGKey(0)
    kx, kp = jax.random.split(key)
    x = jax.random.normal(kx, (BATCH, SEQ, D_MODEL), jnp.float32)
    params = make_params(kp)

    out = jax.block_until_ready(transformer_block(x, params))
    ref = jax.block_until_ready(reference(x, params))

    assert out.shape == (BATCH, SEQ, D_MODEL)
    assert jnp.allclose(out, ref, atol=1e-4, rtol=1e-4), "mismatch vs reference"
    print("KERNEL_OK")
</pallas_src>

<mosaic_0001>
module attributes {stable_mosaic.version = 11 : i64} {
  func.func @transformer_block_kernel(%arg0: memref<2x8x32xf32, #tpu.memory_space<vmem>>, %arg1: memref<32x96xf32, #tpu.memory_space<vmem>>, %arg2: memref<1x96xf32, #tpu.memory_space<vmem>>, %arg3: memref<32x32xf32, #tpu.memory_space<vmem>>, %arg4: memref<1x32xf32, #tpu.memory_space<vmem>>, %arg5: memref<1x32xf32, #tpu.memory_space<vmem>>, %arg6: memref<1x32xf32, #tpu.memory_space<vmem>>, %arg7: memref<32x128xf32, #tpu.memory_space<vmem>>, %arg8: memref<1x128xf32, #tpu.memory_space<vmem>>, %arg9: memref<128x32xf32, #tpu.memory_space<vmem>>, %arg10: memref<1x32xf32, #tpu.memory_space<vmem>>, %arg11: memref<1x32xf32, #tpu.memory_space<vmem>>, %arg12: memref<1x32xf32, #tpu.memory_space<vmem>>, %arg13: memref<2x8x32xf32, #tpu.memory_space<vmem>>) attributes {dimension_semantics = [], scalar_prefetch = 0 : i64, scratch_operands = 0 : i64, tpu.core_type = #tpu.core_type<tc>} {
    %c0 = arith.constant 0 : index
    %c0_0 = arith.constant 0 : index
    %c0_1 = arith.constant 0 : index
    %0 = vector.load %arg0[%c0, %c0_0, %c0_1] : memref<2x8x32xf32, #tpu.memory_space<vmem>>, vector<2x8x32xf32>
    %c0_2 = arith.constant 0 : index
    %c0_3 = arith.constant 0 : index
    %1 = vector.load %arg1[%c0_2, %c0_3] : memref<32x96xf32, #tpu.memory_space<vmem>>, vector<32x96xf32>
    %2 = vector.shape_cast %1 : vector<32x96xf32> to vector<1x32x96xf32>
    %3 = vector.broadcast %2 : vector<1x32x96xf32> to vector<2x32x96xf32>
    "tpu.trace_start"() <{level = 10 : i32, message = "bsd,bdf->bsf"}> : () -> ()
    %cst = arith.constant dense<0.000000e+00> : vector<2x8x96xf32>
    %4 = tpu.matmul %0, %3, %cst {dimension_numbers = #tpu.dot_dimension_numbers<[2], [1], [1], [2], [0, 0, 0, 1, 1, 2], [0], [0]>} : vector<2x8x32xf32>, vector<2x32x96xf32>, vector<2x8x96xf32> -> vector<2x8x96xf32>
    "tpu.trace_stop"() : () -> ()
    %c0_4 = arith.constant 0 : index
    %c0_5 = arith.constant 0 : index
    %5 = vector.load %arg2[%c0_4, %c0_5] : memref<1x96xf32, #tpu.memory_space<vmem>>, vector<1x96xf32>
    %6 = vector.shape_cast %5 : vector<1x96xf32> to vector<1x1x96xf32>
    %7 = vector.broadcast %6 : vector<1x1x96xf32> to vector<2x8x96xf32>
    %8 = arith.addf %4, %7 : vector<2x8x96xf32>
    %9 = vector.extract_strided_slice %8 {offsets = [0, 0, 0], sizes = [2, 8, 32], strides = [1, 1, 1]} : vector<2x8x96xf32> to vector<2x8x32xf32>
    %10 = vector.extract_strided_slice %8 {offsets = [0, 0, 32], sizes = [2, 8, 32], strides = [1, 1, 1]} : vector<2x8x96xf32> to vector<2x8x32xf32>
    %11 = vector.extract_strided_slice %8 {offsets = [0, 0, 64], sizes = [2, 8, 32], strides = [1, 1, 1]} : vector<2x8x96xf32> to vector<2x8x32xf32>
    %c0_6 = arith.constant 0 : index
    %c0_7 = arith.constant 0 : index
    %12 = vector.load %arg3[%c0_6, %c0_7] : memref<32x32xf32, #tpu.memory_space<vmem>>, vector<32x32xf32>
    %13 = vector.shape_cast %12 : vector<32x32xf32> to vector<1x32x32xf32>
    %14 = vector.broadcast %13 : vector<1x32x32xf32> to vector<2x32x32xf32>
    %c0_8 = arith.constant 0 : index
    %c0_9 = arith.constant 0 : index
    %15 = vector.load %arg4[%c0_8, %c0_9] : memref<1x32xf32, #tpu.memory_space<vmem>>, vector<1x32xf32>
    %16 = vector.extract_strided_slice %9 {offsets = [0, 0, 0], sizes = [2, 8, 8], strides = [1, 1, 1]} : vector<2x8x32xf32> to vector<2x8x8xf32>
    %17 = vector.extract_strided_slice %10 {offsets = [0, 0, 0], sizes = [2, 8, 8], strides = [1, 1, 1]} : vector<2x8x32xf32> to vector<2x8x8xf32>
    %18 = vector.extract_strided_slice %11 {offsets = [0, 0, 0], sizes = [2, 8, 8], strides = [1, 1, 1]} : vector<2x8x32xf32> to vector<2x8x8xf32>
    "tpu.trace_start"() <{level = 10 : i32, message = "bqd,bkd->bqk"}> : () -> ()
    %cst_10 = arith.constant dense<0.000000e+00> : vector<2x8x8xf32>
    %19 = tpu.matmul %16, %17, %cst_10 {dimension_numbers = #tpu.dot_dimension_numbers<[2], [2], [1], [1], [0, 0, 0, 1, 1, 1], [0], [0]>} : vector<2x8x8xf32>, vector<2x8x8xf32>, vector<2x8x8xf32> -> vector<2x8x8xf32>
    "tpu.trace_stop"() : () -> ()
    %cst_11 = arith.constant 0.353553385 : f32
    %20 = vector.broadcast %cst_11 : f32 to vector<2x8x8xf32>
    %21 = arith.mulf %19, %20 : vector<2x8x8xf32>
    %cst_12 = arith.constant dense<0xFF800000> : vector<2x8xf32>
    %22 = vector.multi_reduction <maximumf>, %21, %cst_12 [2] : vector<2x8x8xf32> to vector<2x8xf32>
    %23 = vector.shape_cast %22 : vector<2x8xf32> to vector<2x8x1xf32>
    %24 = vector.broadcast %23 : vector<2x8x1xf32> to vector<2x8x8xf32>
    %25 = arith.subf %21, %24 : vector<2x8x8xf32>
    %26 = math.exp %25 : vector<2x8x8xf32>
    %cst_13 = arith.constant dense<0.000000e+00> : vector<2x8xf32>
    %27 = vector.multi_reduction <add>, %26, %cst_13 [2] : vector<2x8x8xf32> to vector<2x8xf32>
    %28 = vector.shape_cast %27 : vector<2x8xf32> to vector<2x8x1xf32>
    %29 = vector.broadcast %28 : vector<2x8x1xf32> to vector<2x8x8xf32>
    %30 = arith.divf %26, %29 : vector<2x8x8xf32>
    "tpu.trace_start"() <{level = 10 : i32, message = "bqk,bkd->bqd"}> : () -> ()
    %cst_14 = arith.constant dense<0.000000e+00> : vector<2x8x8xf32>
    %31 = tpu.matmul %30, %18, %cst_14 {dimension_numbers = #tpu.dot_dimension_numbers<[2], [1], [1], [2], [0, 0, 0, 1, 1, 2], [0], [0]>} : vector<2x8x8xf32>, vector<2x8x8xf32>, vector<2x8x8xf32> -> vector<2x8x8xf32>
    "tpu.trace_stop"() : () -> ()
    %32 = vector.extract_strided_slice %14 {offsets = [0, 0, 0], sizes = [2, 8, 32], strides = [1, 1, 1]} : vector<2x32x32xf32> to vector<2x8x32xf32>
    "tpu.trace_start"() <{level = 10 : i32, message = "bsd,bde->bse"}> : () -> ()
    %cst_15 = arith.constant dense<0.000000e+00> : vector<2x8x32xf32>
    %33 = tpu.matmul %31, %32, %cst_15 {dimension_numbers = #tpu.dot_dimension_numbers<[2], [1], [1], [2], [0, 0, 0, 1, 1, 2], [0], [0]>} : vector<2x8x8xf32>, vector<2x8x32xf32>, vector<2x8x32xf32> -> vector<2x8x32xf32>
    "tpu.trace_stop"() : () -> ()
    %34 = vector.shape_cast %15 : vector<1x32xf32> to vector<1x1x32xf32>
    %35 = vector.broadcast %34 : vector<1x1x32xf32> to vector<2x8x32xf32>
    %36 = arith.addf %35, %33 : vector<2x8x32xf32>
    %37 = vector.extract_strided_slice %9 {offsets = [0, 0, 8], sizes = [2, 8, 8], strides = [1, 1, 1]} : vector<2x8x32xf32> to vector<2x8x8xf32>
    %38 = vector.extract_strided_slice %10 {offsets = [0, 0, 8], sizes = [2, 8, 8], strides = [1, 1, 1]} : vector<2x8x32xf32> to vector<2x8x8xf32>
    %39 = vector.extract_strided_slice %11 {offsets = [0, 0, 8], sizes = [2, 8, 8], strides = [1, 1, 1]} : vector<2x8x32xf32> to vector<2x8x8xf32>
    "tpu.trace_start"() <{level = 10 : i32, message = "bqd,bkd->bqk"}> : () -> ()
    %cst_16 = arith.constant dense<0.000000e+00> : vector<2x8x8xf32>
    %40 = tpu.matmul %37, %38, %cst_16 {dimension_numbers = #tpu.dot_dimension_numbers<[2], [2], [1], [1], [0, 0, 0, 1, 1, 1], [0], [0]>} : vector<2x8x8xf32>, vector<2x8x8xf32>, vector<2x8x8xf32> -> vector<2x8x8xf32>
    "tpu.trace_stop"() : () -> ()
    %cst_17 = arith.constant 0.353553385 : f32
    %41 = vector.broadcast %cst_17 : f32 to vector<2x8x8xf32>
    %42 = arith.mulf %40, %41 : vector<2x8x8xf32>
    %cst_18 = arith.constant dense<0xFF800000> : vector<2x8xf32>
    %43 = vector.multi_reduction <maximumf>, %42, %cst_18 [2] : vector<2x8x8xf32> to vector<2x8xf32>
    %44 = vector.shape_cast %43 : vector<2x8xf32> to vector<2x8x1xf32>
    %45 = vector.broadcast %44 : vector<2x8x1xf32> to vector<2x8x8xf32>
    %46 = arith.subf %42, %45 : vector<2x8x8xf32>
    %47 = math.exp %46 : vector<2x8x8xf32>
    %cst_19 = arith.constant dense<0.000000e+00> : vector<2x8xf32>
    %48 = vector.multi_reduction <add>, %47, %cst_19 [2] : vector<2x8x8xf32> to vector<2x8xf32>
    %49 = vector.shape_cast %48 : vector<2x8xf32> to vector<2x8x1xf32>
    %50 = vector.broadcast %49 : vector<2x8x1xf32> to vector<2x8x8xf32>
    %51 = arith.divf %47, %50 : vector<2x8x8xf32>
    "tpu.trace_start"() <{level = 10 : i32, message = "bqk,bkd->bqd"}> : () -> ()
    %cst_20 = arith.constant dense<0.000000e+00> : vector<2x8x8xf32>
    %52 = tpu.matmul %51, %39, %cst_20 {dimension_numbers = #tpu.dot_dimension_numbers<[2], [1], [1], [2], [0, 0, 0, 1, 1, 2], [0], [0]>} : vector<2x8x8xf32>, vector<2x8x8xf32>, vector<2x8x8xf32> -> vector<2x8x8xf32>
    "tpu.trace_stop"() : () -> ()
    %53 = vector.extract_strided_slice %14 {offsets = [0, 8, 0], sizes = [2, 8, 32], strides = [1, 1, 1]} : vector<2x32x32xf32> to vector<2x8x32xf32>
    "tpu.trace_start"() <{level = 10 : i32, message = "bsd,bde->bse"}> : () -> ()
    %cst_21 = arith.constant dense<0.000000e+00> : vector<2x8x32xf32>
    %54 = tpu.matmul %52, %53, %cst_21 {dimension_numbers = #tpu.dot_dimension_numbers<[2], [1], [1], [2], [0, 0, 0, 1, 1, 2], [0], [0]>} : vector<2x8x8xf32>, vector<2x8x32xf32>, vector<2x8x32xf32> -> vector<2x8x32xf32>
    "tpu.trace_stop"() : () -> ()
    %55 = arith.addf %36, %54 : vector<2x8x32xf32>
    %56 = vector.extract_strided_slice %9 {offsets = [0, 0, 16], sizes = [2, 8, 8], strides = [1, 1, 1]} : vector<2x8x32xf32> to vector<2x8x8xf32>
    %57 = vector.extract_strided_slice %10 {offsets = [0, 0, 16], sizes = [2, 8, 8], strides = [1, 1, 1]} : vector<2x8x32xf32> to vector<2x8x8xf32>
    %58 = vector.extract_strided_slice %11 {offsets = [0, 0, 16], sizes = [2, 8, 8], strides = [1, 1, 1]} : vector<2x8x32xf32> to vector<2x8x8xf32>
    "tpu.trace_start"() <{level = 10 : i32, message = "bqd,bkd->bqk"}> : () -> ()
    %cst_22 = arith.constant dense<0.000000e+00> : vector<2x8x8xf32>
    %59 = tpu.matmul %56, %57, %cst_22 {dimension_numbers = #tpu.dot_dimension_numbers<[2], [2], [1], [1], [0, 0, 0, 1, 1, 1], [0], [0]>} : vector<2x8x8xf32>, vector<2x8x8xf32>, vector<2x8x8xf32> -> vector<2x8x8xf32>
    "tpu.trace_stop"() : () -> ()
    %cst_23 = arith.constant 0.353553385 : f32
    %60 = vector.broadcast %cst_23 : f32 to vector<2x8x8xf32>
    %61 = arith.mulf %59, %60 : vector<2x8x8xf32>
    %cst_24 = arith.constant dense<0xFF800000> : vector<2x8xf32>
    %62 = vector.multi_reduction <maximumf>, %61, %cst_24 [2] : vector<2x8x8xf32> to vector<2x8xf32>
    %63 = vector.shape_cast %62 : vector<2x8xf32> to vector<2x8x1xf32>
    %64 = vector.broadcast %63 : vector<2x8x1xf32> to vector<2x8x8xf32>
    %65 = arith.subf %61, %64 : vector<2x8x8xf32>
    %66 = math.exp %65 : vector<2x8x8xf32>
    %cst_25 = arith.constant dense<0.000000e+00> : vector<2x8xf32>
    %67 = vector.multi_reduction <add>, %66, %cst_25 [2] : vector<2x8x8xf32> to vector<2x8xf32>
    %68 = vector.shape_cast %67 : vector<2x8xf32> to vector<2x8x1xf32>
    %69 = vector.broadcast %68 : vector<2x8x1xf32> to vector<2x8x8xf32>
    %70 = arith.divf %66, %69 : vector<2x8x8xf32>
    "tpu.trace_start"() <{level = 10 : i32, message = "bqk,bkd->bqd"}> : () -> ()
    %cst_26 = arith.constant dense<0.000000e+00> : vector<2x8x8xf32>
    %71 = tpu.matmul %70, %58, %cst_26 {dimension_numbers = #tpu.dot_dimension_numbers<[2], [1], [1], [2], [0, 0, 0, 1, 1, 2], [0], [0]>} : vector<2x8x8xf32>, vector<2x8x8xf32>, vector<2x8x8xf32> -> vector<2x8x8xf32>
    "tpu.trace_stop"() : () -> ()
    %72 = vector.extract_strided_slice %14 {offsets = [0, 16, 0], sizes = [2, 8, 32], strides = [1, 1, 1]} : vector<2x32x32xf32> to vector<2x8x32xf32>
    "tpu.trace_start"() <{level = 10 : i32, message = "bsd,bde->bse"}> : () -> ()
    %cst_27 = arith.constant dense<0.000000e+00> : vector<2x8x32xf32>
    %73 = tpu.matmul %71, %72, %cst_27 {dimension_numbers = #tpu.dot_dimension_numbers<[2], [1], [1], [2], [0, 0, 0, 1, 1, 2], [0], [0]>} : vector<2x8x8xf32>, vector<2x8x32xf32>, vector<2x8x32xf32> -> vector<2x8x32xf32>
    "tpu.trace_stop"() : () -> ()
    %74 = arith.addf %55, %73 : vector<2x8x32xf32>
    %75 = vector.extract_strided_slice %9 {offsets = [0, 0, 24], sizes = [2, 8, 8], strides = [1, 1, 1]} : vector<2x8x32xf32> to vector<2x8x8xf32>
    %76 = vector.extract_strided_slice %10 {offsets = [0, 0, 24], sizes = [2, 8, 8], strides = [1, 1, 1]} : vector<2x8x32xf32> to vector<2x8x8xf32>
    %77 = vector.extract_strided_slice %11 {offsets = [0, 0, 24], sizes = [2, 8, 8], strides = [1, 1, 1]} : vector<2x8x32xf32> to vector<2x8x8xf32>
    "tpu.trace_start"() <{level = 10 : i32, message = "bqd,bkd->bqk"}> : () -> ()
    %cst_28 = arith.constant dense<0.000000e+00> : vector<2x8x8xf32>
    %78 = tpu.matmul %75, %76, %cst_28 {dimension_numbers = #tpu.dot_dimension_numbers<[2], [2], [1], [1], [0, 0, 0, 1, 1, 1], [0], [0]>} : vector<2x8x8xf32>, vector<2x8x8xf32>, vector<2x8x8xf32> -> vector<2x8x8xf32>
    "tpu.trace_stop"() : () -> ()
    %cst_29 = arith.constant 0.353553385 : f32
    %79 = vector.broadcast %cst_29 : f32 to vector<2x8x8xf32>
    %80 = arith.mulf %78, %79 : vector<2x8x8xf32>
    %cst_30 = arith.constant dense<0xFF800000> : vector<2x8xf32>
    %81 = vector.multi_reduction <maximumf>, %80, %cst_30 [2] : vector<2x8x8xf32> to vector<2x8xf32>
    %82 = vector.shape_cast %81 : vector<2x8xf32> to vector<2x8x1xf32>
    %83 = vector.broadcast %82 : vector<2x8x1xf32> to vector<2x8x8xf32>
    %84 = arith.subf %80, %83 : vector<2x8x8xf32>
    %85 = math.exp %84 : vector<2x8x8xf32>
    %cst_31 = arith.constant dense<0.000000e+00> : vector<2x8xf32>
    %86 = vector.multi_reduction <add>, %85, %cst_31 [2] : vector<2x8x8xf32> to vector<2x8xf32>
    %87 = vector.shape_cast %86 : vector<2x8xf32> to vector<2x8x1xf32>
    %88 = vector.broadcast %87 : vector<2x8x1xf32> to vector<2x8x8xf32>
    %89 = arith.divf %85, %88 : vector<2x8x8xf32>
    "tpu.trace_start"() <{level = 10 : i32, message = "bqk,bkd->bqd"}> : () -> ()
    %cst_32 = arith.constant dense<0.000000e+00> : vector<2x8x8xf32>
    %90 = tpu.matmul %89, %77, %cst_32 {dimension_numbers = #tpu.dot_dimension_numbers<[2], [1], [1], [2], [0, 0, 0, 1, 1, 2], [0], [0]>} : vector<2x8x8xf32>, vector<2x8x8xf32>, vector<2x8x8xf32> -> vector<2x8x8xf32>
    "tpu.trace_stop"() : () -> ()
    %91 = vector.extract_strided_slice %14 {offsets = [0, 24, 0], sizes = [2, 8, 32], strides = [1, 1, 1]} : vector<2x32x32xf32> to vector<2x8x32xf32>
    "tpu.trace_start"() <{level = 10 : i32, message = "bsd,bde->bse"}> : () -> ()
    %cst_33 = arith.constant dense<0.000000e+00> : vector<2x8x32xf32>
    %92 = tpu.matmul %90, %91, %cst_33 {dimension_numbers = #tpu.dot_dimension_numbers<[2], [1], [1], [2], [0, 0, 0, 1, 1, 2], [0], [0]>} : vector<2x8x8xf32>, vector<2x8x32xf32>, vector<2x8x32xf32> -> vector<2x8x32xf32>
    "tpu.trace_stop"() : () -> ()
    %93 = arith.addf %74, %92 : vector<2x8x32xf32>
    %94 = arith.addf %0, %93 : vector<2x8x32xf32>
    %c0_34 = arith.constant 0 : index
    %c0_35 = arith.constant 0 : index
    %95 = vector.load %arg5[%c0_34, %c0_35] : memref<1x32xf32, #tpu.memory_space<vmem>>, vector<1x32xf32>
    %c0_36 = arith.constant 0 : index
    %c0_37 = arith.constant 0 : index
    %96 = vector.load %arg6[%c0_36, %c0_37] : memref<1x32xf32, #tpu.memory_space<vmem>>, vector<1x32xf32>
    %cst_38 = arith.constant dense<0.000000e+00> : vector<2x8xf32>
    %97 = vector.multi_reduction <add>, %94, %cst_38 [2] : vector<2x8x32xf32> to vector<2x8xf32>
    %98 = vector.shape_cast %97 : vector<2x8xf32> to vector<2x8x1xf32>
    %cst_39 = arith.constant 3.200000e+01 : f32
    %99 = vector.broadcast %cst_39 : f32 to vector<2x8x1xf32>
    %100 = arith.divf %98, %99 : vector<2x8x1xf32>
    %101 = vector.broadcast %100 : vector<2x8x1xf32> to vector<2x8x32xf32>
    %102 = arith.subf %94, %101 : vector<2x8x32xf32>
    %103 = arith.mulf %102, %102 : vector<2x8x32xf32>
    %cst_40 = arith.constant dense<0.000000e+00> : vector<2x8xf32>
    %104 = vector.multi_reduction <add>, %103, %cst_40 [2] : vector<2x8x32xf32> to vector<2x8xf32>
    %105 = vector.shape_cast %104 : vector<2x8xf32> to vector<2x8x1xf32>
    %cst_41 = arith.constant 3.200000e+01 : f32
    %106 = vector.broadcast %cst_41 : f32 to vector<2x8x1xf32>
    %107 = arith.divf %105, %106 : vector<2x8x1xf32>
    %108 = vector.broadcast %100 : vector<2x8x1xf32> to vector<2x8x32xf32>
    %109 = arith.subf %94, %108 : vector<2x8x32xf32>
    %cst_42 = arith.constant 9.99999974E-6 : f32
    %110 = vector.broadcast %cst_42 : f32 to vector<2x8x1xf32>
    %111 = arith.addf %107, %110 : vector<2x8x1xf32>
    %112 = math.rsqrt %111 : vector<2x8x1xf32>
    %113 = vector.broadcast %112 : vector<2x8x1xf32> to vector<2x8x32xf32>
    %114 = arith.mulf %109, %113 : vector<2x8x32xf32>
    %115 = vector.shape_cast %95 : vector<1x32xf32> to vector<1x1x32xf32>
    %116 = vector.broadcast %115 : vector<1x1x32xf32> to vector<2x8x32xf32>
    %117 = arith.mulf %114, %116 : vector<2x8x32xf32>
    %118 = vector.shape_cast %96 : vector<1x32xf32> to vector<1x1x32xf32>
    %119 = vector.broadcast %118 : vector<1x1x32xf32> to vector<2x8x32xf32>
    %120 = arith.addf %117, %119 : vector<2x8x32xf32>
    %c0_43 = arith.constant 0 : index
    %c0_44 = arith.constant 0 : index
    %121 = vector.load %arg7[%c0_43, %c0_44] : memref<32x128xf32, #tpu.memory_space<vmem>>, vector<32x128xf32>
    %122 = vector.shape_cast %121 : vector<32x128xf32> to vector<1x32x128xf32>
    %123 = vector.broadcast %122 : vector<1x32x128xf32> to vector<2x32x128xf32>
    "tpu.trace_start"() <{level = 10 : i32, message = "bsd,bdf->bsf"}> : () -> ()
    %cst_45 = arith.constant dense<0.000000e+00> : vector<2x8x128xf32>
    %124 = tpu.matmul %120, %123, %cst_45 {dimension_numbers = #tpu.dot_dimension_numbers<[2], [1], [1], [2], [0, 0, 0, 1, 1, 2], [0], [0]>} : vector<2x8x32xf32>, vector<2x32x128xf32>, vector<2x8x128xf32> -> vector<2x8x128xf32>
    "tpu.trace_stop"() : () -> ()
    %c0_46 = arith.constant 0 : index
    %c0_47 = arith.constant 0 : index
    %125 = vector.load %arg8[%c0_46, %c0_47] : memref<1x128xf32, #tpu.memory_space<vmem>>, vector<1x128xf32>
    %126 = vector.shape_cast %125 : vector<1x128xf32> to vector<1x1x128xf32>
    %127 = vector.broadcast %126 : vector<1x1x128xf32> to vector<2x8x128xf32>
    %128 = arith.addf %124, %127 : vector<2x8x128xf32>
    %cst_48 = arith.constant 0.000000e+00 : f32
    %129 = vector.broadcast %cst_48 : f32 to vector<2x8x128xf32>
    %130 = arith.maximumf %128, %129 : vector<2x8x128xf32>
    %c0_49 = arith.constant 0 : index
    %c0_50 = arith.constant 0 : index
    %131 = vector.load %arg9[%c0_49, %c0_50] : memref<128x32xf32, #tpu.memory_space<vmem>>, vector<128x32xf32>
    %132 = vector.shape_cast %131 : vector<128x32xf32> to vector<1x128x32xf32>
    %133 = vector.broadcast %132 : vector<1x128x32xf32> to vector<2x128x32xf32>
    "tpu.trace_start"() <{level = 10 : i32, message = "bsf,bfd->bsd"}> : () -> ()
    %cst_51 = arith.constant dense<0.000000e+00> : vector<2x8x32xf32>
    %134 = tpu.matmul %130, %133, %cst_51 {dimension_numbers = #tpu.dot_dimension_numbers<[2], [1], [1], [2], [0, 0, 0, 1, 1, 2], [0], [0]>} : vector<2x8x128xf32>, vector<2x128x32xf32>, vector<2x8x32xf32> -> vector<2x8x32xf32>
    "tpu.trace_stop"() : () -> ()
    %c0_52 = arith.constant 0 : index
    %c0_53 = arith.constant 0 : index
    %135 = vector.load %arg10[%c0_52, %c0_53] : memref<1x32xf32, #tpu.memory_space<vmem>>, vector<1x32xf32>
    %136 = vector.shape_cast %135 : vector<1x32xf32> to vector<1x1x32xf32>
    %137 = vector.broadcast %136 : vector<1x1x32xf32> to vector<2x8x32xf32>
    %138 = arith.addf %134, %137 : vector<2x8x32xf32>
    %139 = arith.addf %120, %138 : vector<2x8x32xf32>
    %c0_54 = arith.constant 0 : index
    %c0_55 = arith.constant 0 : index
    %140 = vector.load %arg11[%c0_54, %c0_55] : memref<1x32xf32, #tpu.memory_space<vmem>>, vector<1x32xf32>
    %c0_56 = arith.constant 0 : index
    %c0_57 = arith.constant 0 : index
    %141 = vector.load %arg12[%c0_56, %c0_57] : memref<1x32xf32, #tpu.memory_space<vmem>>, vector<1x32xf32>
    %cst_58 = arith.constant dense<0.000000e+00> : vector<2x8xf32>
    %142 = vector.multi_reduction <add>, %139, %cst_58 [2] : vector<2x8x32xf32> to vector<2x8xf32>
    %143 = vector.shape_cast %142 : vector<2x8xf32> to vector<2x8x1xf32>
    %cst_59 = arith.constant 3.200000e+01 : f32
    %144 = vector.broadcast %cst_59 : f32 to vector<2x8x1xf32>
    %145 = arith.divf %143, %144 : vector<2x8x1xf32>
    %146 = vector.broadcast %145 : vector<2x8x1xf32> to vector<2x8x32xf32>
    %147 = arith.subf %139, %146 : vector<2x8x32xf32>
    %148 = arith.mulf %147, %147 : vector<2x8x32xf32>
    %cst_60 = arith.constant dense<0.000000e+00> : vector<2x8xf32>
    %149 = vector.multi_reduction <add>, %148, %cst_60 [2] : vector<2x8x32xf32> to vector<2x8xf32>
    %150 = vector.shape_cast %149 : vector<2x8xf32> to vector<2x8x1xf32>
    %cst_61 = arith.constant 3.200000e+01 : f32
    %151 = vector.broadcast %cst_61 : f32 to vector<2x8x1xf32>
    %152 = arith.divf %150, %151 : vector<2x8x1xf32>
    %153 = vector.broadcast %145 : vector<2x8x1xf32> to vector<2x8x32xf32>
    %154 = arith.subf %139, %153 : vector<2x8x32xf32>
    %cst_62 = arith.constant 9.99999974E-6 : f32
    %155 = vector.broadcast %cst_62 : f32 to vector<2x8x1xf32>
    %156 = arith.addf %152, %155 : vector<2x8x1xf32>
    %157 = math.rsqrt %156 : vector<2x8x1xf32>
    %158 = vector.broadcast %157 : vector<2x8x1xf32> to vector<2x8x32xf32>
    %159 = arith.mulf %154, %158 : vector<2x8x32xf32>
    %160 = vector.shape_cast %140 : vector<1x32xf32> to vector<1x1x32xf32>
    %161 = vector.broadcast %160 : vector<1x1x32xf32> to vector<2x8x32xf32>
    %162 = arith.mulf %159, %161 : vector<2x8x32xf32>
    %163 = vector.shape_cast %141 : vector<1x32xf32> to vector<1x1x32xf32>
    %164 = vector.broadcast %163 : vector<1x1x32xf32> to vector<2x8x32xf32>
    %165 = arith.addf %162, %164 : vector<2x8x32xf32>
    %c0_63 = arith.constant 0 : index
    %c0_64 = arith.constant 0 : index
    %c0_65 = arith.constant 0 : index
    %166 = vector.load %arg13[%c0_63, %c0_64, %c0_65] : memref<2x8x32xf32, #tpu.memory_space<vmem>>, vector<2x8x32xf32>
    tpu.vector_store %arg13[%c0_63, %c0_64, %c0_65], %165 {strides = array<i32>} : memref<2x8x32xf32, #tpu.memory_space<vmem>>, vector<2x8x32xf32>,
    return
  }
}

</mosaic_0001>

<bundles_post_ra>
// kernel: transformer_block.1
= control target key start
LH: loop header
LB: loop body
LE: loop exit
PB: predicated region body
PF: predicated region fallthrough
CT: control target
= control target key end

     0   :  { %v3026_v1 = vmov 0.0   ;;  %s3485_s0 = inlined_call_operand.vmem [shape: f32[2,8,32], index: 0, kind: input, shape index: {}]   ;;  %s3486_s1 = inlined_call_operand.vmem [shape: f32[32,96], index: 1, kind: input, shape index: {}]   ;;  %s3487_s2 = inlined_call_operand.vmem [shape: f32[1,96], index: 2, kind: input, shape index: {}]   ;;  %s3488_s3 = inlined_call_operand.vmem [shape: f32[32,32], index: 3, kind: input, shape index: {}]   ;;  %s3489_s4 = inlined_call_operand.vmem [shape: f32[1,32], index: 4, kind: input, shape index: {}]   ;;  %s3490_s5 = inlined_call_operand.vmem [shape: f32[1,32], index: 5, kind: input, shape index: {}]   ;;  %s3491_s6 = inlined_call_operand.vmem [shape: f32[1,32], index: 6, kind: input, shape index: {}]   ;;  %s3492_s7 = inlined_call_operand.vmem [shape: f32[32,128], index: 7, kind: input, shape index: {}]   ;;  %s3493_s8 = inlined_call_operand.vmem [shape: f32[1,128], index: 8, kind: input, shape index: {}]   ;;  %s3494_s9 = inlined_call_operand.vmem [shape: f32[128,32], index: 9, kind: input, shape index: {}]   ;;  %s3495_s10 = inlined_call_operand.vmem [shape: f32[1,32], index: 10, kind: input, shape index: {}]   ;;  %s3496_s11 = inlined_call_operand.vmem [shape: f32[1,32], index: 11, kind: input, shape index: {}]   ;;  %s3497_s12 = inlined_call_operand.vmem [shape: f32[1,32], index: 12, kind: input, shape index: {}]   ;;  %s3498_s13 = inlined_call_operand.hbm [shape: f32[2,8,32], index: 13, kind: output, shape index: {}]  }
   0x1   :  { %v50_v0 = vld [vmem:[%s3486_s1 + $0x18] sm:$0xff]  ;;  %2714 = vmatprep.subr.mxu0 %v3026_v1  ;;  %2725 = vmatprep.subr.mxu1 %v3026_v1  ;;  %v49_v2 = vld [vmem:[%s3486_s1 + $0x10] sm:$0xff] }
   0x2   :  { %2715 = vmatpush3.msra.mxu0 %v50_v0  ;;  %2726 = vmatpush3.msra.mxu1 %v50_v0 }
   0x3   :  { %18 = vsyncpa [#allocation3], 0  ;;  %2716 = vmatprep.subr.mxu0 %v3026_v1  ;;  %2727 = vmatprep.subr.mxu1 %v3026_v1  ;;  %v48_v3 = vld [vmem:[%s3486_s1 + $0x8] sm:$0xff]  ;;  %v47_v4 = vld [vmem:[%s3486_s1] sm:$0xff]  ;;  %vm3027_vm0 = vmmov 0   ;;  %vm58_vm1 = vcmask 261120  }
   0x4   :  { %2717 = vmatpush3.msra.mxu0 %v49_v2  ;;  %2728 = vmatpush3.msra.mxu1 %v49_v2  ;;  %v3135_v5 = vld [vmem:[%s3485_s0] sm:$0xff]  ;;  %v3142_v6 = vld [vmem:[%s3485_s0 + $0x8] sm:$0xff]  ;;  %s3028_s20 = smov 96   ;;  %vm213_vm2 = vcmask 64512   ;;  %s3030_s21 = smov 120  }
   0x5   :  { %2718 = vmatprep.subr.mxu0 %v3026_v1  ;;  %2729 = vmatprep.subr.mxu1 %v3026_v1  ;;  %v2568_v7 = vld [vmem:[%s3487_s2] ss:$0 sm:$0xff]  ;;  %s3029_s2 = smov 64   ;;  %s3031_s22 = smov 88  }
   0x6   :  { %2719 = vmatpush3.msra.mxu0 %v48_v3  ;;  %2722 = vmatprep.mubr.msk.f32.mxu0 %vm3027_vm0, %v3026_v1  ;;  %v205_v40 = vld [vmem:[%s3488_s3] sm:$0xff]  ;;  %s3032_s25 = smov 56   ;;  %s3033_s26 = smov 112  }
   0x7   :  { %2720 = vmatprep.subr.mxu0 %v3026_v1  ;;  %2730 = vmatpush3.msra.mxu1 %v48_v3  ;;  %s3034_s27 = smov 80   ;;  %s3036_s15 = smov 72  }
   0x8   :  { %2721 = vmatpush3.msra.mxu0 %v47_v4  ;;  %2731 = vmatprep.subr.mxu1 %v3026_v1  ;;  %s3037_s16 = smov 104   ;;  %s3038_s19 = smov 40  }
   0x9   :  { %2723 = vmatmul.mubr.msk.f32.vlgmr.msra.gmra.mxu0 %vm58_vm1, %v3135_v5  ;;  %2732 = vmatpush3.msra.mxu1 %v47_v4  ;;  %s3039_s1 = smov [#allocation2]  }
   0xa   :  { %2733 = vmatprep.mubr.msk.f32.mxu1 %vm3027_vm0, %v3026_v1  ;;  %2736 = vmatprep.subr.mxu0 %v3026_v1 }
   0xb   :  { %2734 = vmatmul.mubr.msk.f32.vlgmr.msra.gmra.mxu1 %vm58_vm1, %v3142_v6  ;;  %2738 = vmatprep.mubr.msk.f32.mxu0 %vm3027_vm0, %v3026_v1 }
   0xc   :  { %2741 = vmatprep.subr.mxu1 %v3026_v1  ;;  %2743 = vmatprep.mubr.msk.f32.mxu1 %vm3027_vm0, %v3026_v1 }
  0xc9   :  { %v128_v8 = vpop.f32.mrf.mxu0 }
  0xca   :  { %v3159_v9 = vadd.f32 %v2568_v7, %v128_v8 }
  0xcb   :  { %v2724_v10 = vpop.f32.mrf.mxu0  ;;  %v201_v11 = vpop.f32.mrf.mxu1 }
  0xcc   :  { %v3161_v12 = vadd.f32 %v2568_v7, %v201_v11  ;;  %211 = vrot.lane.b32.xlu0 %v3159_v9, %s3028_s20 }
  0xcd   :  { %v2735_v13 = vpop.f32.mrf.mxu1 }
  0xd0   :  { %289 = vrot.lane.b32.xlu0 %v3161_v12, %s3028_s20 }
 0x13e   :  { %v212_v14 = vpop.permute.xlu0 %211 }
 0x13f   :  { %2737 = vmatpush3.xpose.msk.msra.mxu0 %vm213_vm2, %v212_v14 }
 0x140   :  { %2746 = vmatprep.subr.mxu0 %v3026_v1 }
 0x142   :  { %2739 = vmatmul.mubr.msk.f32.vlgmr.msra.gmra.mxu0 %vm213_vm2, %v3159_v9  ;;  %v290_v15 = vpop.permute.xlu0 %289 }
 0x143   :  { %2742 = vmatpush3.xpose.msk.msra.mxu1 %vm213_vm2, %v290_v15  ;;  %2748 = vmatprep.mubr.msk.f32.mxu0 %vm3027_vm0, %v3026_v1 }
 0x144   :  { %2751 = vmatprep.subr.mxu1 %v3026_v1 }
 0x146   :  { %2744 = vmatmul.mubr.msk.f32.vlgmr.msra.gmra.mxu1 %vm213_vm2, %v3161_v12 }
 0x147   :  { %2753 = vmatprep.mubr.msk.f32.mxu1 %vm3027_vm0, %v3026_v1 }
 0x202   :  { %v284_v16 = vpop.f32.mrf.mxu0 }
 0x203   :  { %v365_v17 = vmul.f32 0.35355338, %v284_v16 }
 0x204   :  { %v2740_v18 = vpop.f32.mrf.mxu0 }
 0x205   :  { %v367_v19 = vsel %vm213_vm2, %v365_v17, -inf }
 0x206   :  { %v361_v20 = vpop.f32.mrf.mxu1  ;;  %368 = vmax.xlane.f32.xlu1 %v367_v19 }
 0x207   :  { %v366_v21 = vmul.f32 0.35355338, %v361_v20  ;;  %v206_v20 = vld [vmem:[%s3488_s3 + $0x8] sm:$0xff] }
 0x208   :  { %v2745_v22 = vpop.f32.mrf.mxu1 }
 0x209   :  { %v370_v23 = vsel %vm213_vm2, %v366_v21, -inf }
 0x20a   :  { %371 = vmax.xlane.f32.xlu1 %v370_v23 }
 0x21b   :  { %389 = vrot.lane.b32.xlu1 %v3159_v9, %s3029_s2 }
 0x28f   :  { %v369_v24 = vpop.xlane.xlu1 %368 }
 0x290   :  { %v373_v25 = vsub.f32 %v365_v17, %v369_v24 }
 0x292   :  { %v375_v26 = vmul.f32 1.442695, %v373_v25 }
 0x293   :  { %v372_v27 = vpop.xlane.xlu1 %371 }
 0x294   :  { %2964 = vpow2.f32 %v375_v26  ;;  %v374_v28 = vsub.f32 %v366_v21, %v372_v27 }
 0x296   :  { %v377_v29 = vmul.f32 1.442695, %v374_v28 }
 0x297   :  { %v390_v30 = vpop.permute.xlu1 %389 }
 0x298   :  { %2966 = vpow2.f32 %v377_v29  ;;  %2747 = vmatpush3.msra.mxu0 %v390_v30 }
 0x299   :  { %2756 = vmatprep.subr.mxu0 %v3026_v1 }
 0x2a1   :  { %v2965_v31 = vpop.eup %2964 }
 0x2a2   :  { %v379_v32 = vsel %vm213_vm2, %v2965_v31, 0.0 }
 0x2a3   :  { %380 = vadd.xlane.f32.xlu0 %v379_v32 }
 0x2a5   :  { %v2967_v33 = vpop.eup %2966 }
 0x2a6   :  { %v382_v34 = vsel %vm213_vm2, %v2967_v33, 0.0 }
 0x2a7   :  { %383 = vadd.xlane.f32.xlu1 %v382_v34 }
 0x2b8   :  { %465 = vrot.lane.b32.xlu1 %v3161_v12, %s3029_s2 }
 0x2b9   :  { %695 = vrot.lane.b32.xlu0 %v3159_v9, %s3030_s21 }
 0x2bc   :  { %697 = vrot.lane.b32.xlu1 %v3159_v9, %s3031_s22 }
 0x2c0   :  { %775 = vrot.lane.b32.xlu1 %v3161_v12, %s3031_s22 }
 0x2c4   :  { %773 = vrot.lane.b32.xlu1 %v3161_v12, %s3030_s21 }
 0x32c   :  { %v381_v35 = vpop.xlane.xlu0 %380 }
 0x32d   :  { %2968 = vrcp.f32 %v381_v35 }
 0x330   :  { %v384_v36 = vpop.xlane.xlu1 %383  ;;  %v696_v47 = vpop.permute.xlu0 %695 }
 0x331   :  { %2970 = vrcp.f32 %v384_v36 }
 0x334   :  { %v466_v37 = vpop.permute.xlu1 %465 }
 0x335   :  { %2752 = vmatpush3.msra.mxu1 %v466_v37 }
 0x336   :  { %2761 = vmatprep.subr.mxu1 %v3026_v1 }
 0x338   :  { %v698_v43 = vpop.permute.xlu1 %697 }
 0x33a   :  { %v2969_v38 = vpop.eup %2968 }
 0x33b   :  { %v386_v39 = vmul.f32 %v2969_v38, %v2965_v31  ;;  %v2579_v31 = vld [vmem:[%s3489_s4] ss:$0 sm:$0xff]  ;;  %s3035_s4 = smov 48  }
 0x33c   :  { %v776_v45 = vpop.permute.xlu1 %775 }
 0x33d   :  { %2749 = vmatmul.mubr.msk.f32.vlgmr.msra.gmra.mxu0 %vm213_vm2, %v386_v39 }
 0x33e   :  { %v2971_v41 = vpop.eup %2970  ;;  %2757 = vmatpush3.msra.mxu0 %v205_v40  ;;  %2758 = vmatprep.mubr.msk.f32.mxu0 %vm3027_vm0, %v3026_v1 }
 0x33f   :  { %v388_v42 = vmul.f32 %v2971_v41, %v2967_v33  ;;  %2766 = vmatprep.subr.mxu0 %v3026_v1 }
 0x340   :  { %v774_v50 = vpop.permute.xlu1 %773 }
 0x341   :  { %2754 = vmatmul.mubr.msk.f32.vlgmr.msra.gmra.mxu1 %vm213_vm2, %v388_v42 }
 0x342   :  { %2762 = vmatpush3.msra.mxu1 %v205_v40  ;;  %2763 = vmatprep.mubr.msk.f32.mxu1 %vm3027_vm0, %v3026_v1 }
 0x343   :  { %2771 = vmatprep.subr.mxu1 %v3026_v1 }
 0x3fd   :  { %v461_v44 = vpop.f32.mrf.mxu0 }
 0x3fe   :  { %2759 = vmatmul.mubr.msk.f32.vlgmr.msra.gmra.mxu0 %vm213_vm2, %v461_v44 }
 0x3ff   :  { %2767 = vmatpush3.xpose.msk.msra.mxu0 %vm213_vm2, %v698_v43  ;;  %v2750_v46 = vpop.f32.mrf.mxu0  ;;  %2768 = vmatprep.mubr.msk.f32.mxu0 %vm3027_vm0, %v3026_v1 }
 0x400   :  { %2776 = vmatprep.subr.mxu0 %v3026_v1 }
 0x401   :  { %v537_v48 = vpop.f32.mrf.mxu1 }
 0x402   :  { %2764 = vmatmul.mubr.msk.f32.vlgmr.msra.gmra.mxu1 %vm213_vm2, %v537_v48  ;;  %2769 = vmatmul.mubr.msk.f32.vlgmr.msra.gmra.mxu0 %vm213_vm2, %v696_v47 }
 0x403   :  { %2772 = vmatpush3.xpose.msk.msra.mxu1 %vm213_vm2, %v776_v45  ;;  %v2755_v49 = vpop.f32.mrf.mxu1  ;;  %2773 = vmatprep.mubr.msk.f32.mxu1 %vm3027_vm0, %v3026_v1 }
 0x404   :  { %2781 = vmatprep.subr.mxu1 %v3026_v1  ;;  %2778 = vmatprep.mubr.msk.f32.mxu0 %vm3027_vm0, %v3026_v1 }
 0x406   :  { %2774 = vmatmul.mubr.msk.f32.vlgmr.msra.gmra.mxu1 %vm213_vm2, %v774_v50 }
 0x407   :  { %2783 = vmatprep.mubr.msk.f32.mxu1 %vm3027_vm0, %v3026_v1 }
 0x4be   :  { %v3216_v51 = vpop.f32.mrf.mxu0 }
 0x4bf   :  { %v693_v32 = vadd.f32 %v2579_v31, %v3216_v51 }
 0x4c0   :  { %v2760_v52 = vpop.f32.mrf.mxu0 }
 0x4c2   :  { %v3218_v53 = vpop.f32.mrf.mxu1  ;;  %v769_v54 = vpop.f32.mrf.mxu0 }
 0x4c3   :  { %v851_v55 = vmul.f32 0.35355338, %v769_v54  ;;  %v694_v36 = vadd.f32 %v2579_v31, %v3218_v53 }
 0x4c4   :  { %v2765_v56 = vpop.f32.mrf.mxu1  ;;  %v2770_v57 = vpop.f32.mrf.mxu0 }
 0x4c5   :  { %v853_v58 = vsel %vm213_vm2, %v851_v55, -inf }
 0x4c6   :  { %v847_v59 = vpop.f32.mrf.mxu1  ;;  %854 = vmax.xlane.f32.xlu1 %v853_v58 }
 0x4c7   :  { %v852_v60 = vmul.f32 0.35355338, %v847_v59 }
 0x4c8   :  { %v2775_v61 = vpop.f32.mrf.mxu1 }
 0x4c9   :  { %v856_v62 = vsel %vm213_vm2, %v852_v60, -inf }
 0x4ca   :  { %857 = vmax.xlane.f32.xlu0 %v856_v62 }
 0x4e0   :  { %951 = vrot.lane.b32.xlu0 %v3161_v12, %s3032_s25 }
 0x4e4   :  { %1175 = vrot.lane.b32.xlu0 %v3159_v9, %s3033_s26 }
 0x54f   :  { %v855_v63 = vpop.xlane.xlu1 %854 }
 0x550   :  { %v859_v0 = vsub.f32 %v851_v55, %v855_v63 }
 0x552   :  { %v861_v2 = vmul.f32 1.442695, %v859_v0  ;;  %v207_v0 = vld [vmem:[%s3488_s3 + $0x10] sm:$0xff] }
 0x553   :  { %v858_v3 = vpop.xlane.xlu0 %857 }
 0x554   :  { %2972 = vpow2.f32 %v861_v2  ;;  %v860_v4 = vsub.f32 %v852_v60, %v858_v3 }
 0x556   :  { %v863_v7 = vmul.f32 1.442695, %v860_v4 }
 0x557   :  { %v952_v8 = vpop.permute.xlu0 %951 }
 0x558   :  { %2974 = vpow2.f32 %v863_v7  ;;  %2782 = vmatpush3.msra.mxu1 %v952_v8 }
 0x559   :  { %2791 = vmatprep.subr.mxu1 %v3026_v1 }
 0x55b   :  { %v1176_v27 = vpop.permute.xlu0 %1175 }
 0x561   :  { %v2973_v10 = vpop.eup %2972 }
 0x562   :  { %v865_v11 = vsel %vm213_vm2, %v2973_v10, 0.0 }
 0x563   :  { %866 = vadd.xlane.f32.xlu1 %v865_v11 }
 0x565   :  { %v2975_v13 = vpop.eup %2974 }
 0x566   :  { %v868_v14 = vsel %vm213_vm2, %v2975_v13, 0.0 }
 0x567   :  { %869 = vadd.xlane.f32.xlu1 %v868_v14 }
 0x578   :  { %875 = vrot.lane.b32.xlu1 %v3159_v9, %s3032_s25 }
 0x57c   :  { %1177 = vrot.lane.b32.xlu1 %v3159_v9, %s3034_s27 }
 0x580   :  { %1255 = vrot.lane.b32.xlu1 %v3161_v12, %s3034_s27 }
 0x584   :  { %1253 = vrot.lane.b32.xlu1 %v3161_v12, %s3033_s26 }
 0x5ec   :  { %v867_v15 = vpop.xlane.xlu1 %866 }
 0x5ed   :  { %2976 = vrcp.f32 %v867_v15 }
 0x5f0   :  { %v870_v16 = vpop.xlane.xlu1 %869 }
 0x5f1   :  { %2978 = vrcp.f32 %v870_v16 }
 0x5f4   :  { %v876_v17 = vpop.permute.xlu1 %875 }
 0x5f5   :  { %2777 = vmatpush3.msra.mxu0 %v876_v17 }
 0x5f6   :  { %2786 = vmatprep.subr.mxu0 %v3026_v1 }
 0x5f8   :  { %v1178_v23 = vpop.permute.xlu1 %1177 }
 0x5fa   :  { %v2977_v18 = vpop.eup %2976 }
 0x5fb   :  { %v872_v19 = vmul.f32 %v2977_v18, %v2973_v10 }
 0x5fc   :  { %v1256_v25 = vpop.permute.xlu1 %1255 }
 0x5fd   :  { %2779 = vmatmul.mubr.msk.f32.vlgmr.msra.gmra.mxu0 %vm213_vm2, %v872_v19 }
 0x5fe   :  { %v2979_v21 = vpop.eup %2978  ;;  %2787 = vmatpush3.msra.mxu0 %v206_v20  ;;  %2788 = vmatprep.mubr.msk.f32.mxu0 %vm3027_vm0, %v3026_v1 }
 0x5ff   :  { %v874_v22 = vmul.f32 %v2979_v21, %v2975_v13  ;;  %2796 = vmatprep.subr.mxu0 %v3026_v1 }
 0x600   :  { %v1254_v30 = vpop.permute.xlu1 %1253 }
 0x601   :  { %2784 = vmatmul.mubr.msk.f32.vlgmr.msra.gmra.mxu1 %vm213_vm2, %v874_v22 }
 0x602   :  { %2792 = vmatpush3.msra.mxu1 %v206_v20  ;;  %2793 = vmatprep.mubr.msk.f32.mxu1 %vm3027_vm0, %v3026_v1 }
 0x603   :  { %2801 = vmatprep.subr.mxu1 %v3026_v1 }
 0x6bd   :  { %v947_v24 = vpop.f32.mrf.mxu0 }
 0x6be   :  { %2789 = vmatmul.mubr.msk.f32.vlgmr.msra.gmra.mxu0 %vm213_vm2, %v947_v24 }
 0x6bf   :  { %2797 = vmatpush3.xpose.msk.msra.mxu0 %vm213_vm2, %v1178_v23  ;;  %v2780_v26 = vpop.f32.mrf.mxu0  ;;  %2798 = vmatprep.mubr.msk.f32.mxu0 %vm3027_vm0, %v3026_v1 }
 0x6c0   :  { %2806 = vmatprep.subr.mxu0 %v3026_v1 }
 0x6c1   :  { %v1023_v28 = vpop.f32.mrf.mxu1 }
 0x6c2   :  { %2794 = vmatmul.mubr.msk.f32.vlgmr.msra.gmra.mxu1 %vm213_vm2, %v1023_v28  ;;  %2799 = vmatmul.mubr.msk.f32.vlgmr.msra.gmra.mxu0 %vm213_vm2, %v1176_v27 }
 0x6c3   :  { %2802 = vmatpush3.xpose.msk.msra.mxu1 %vm213_vm2, %v1256_v25  ;;  %v2785_v29 = vpop.f32.mrf.mxu1  ;;  %2803 = vmatprep.mubr.msk.f32.mxu1 %vm3027_vm0, %v3026_v1 }
 0x6c4   :  { %2811 = vmatprep.subr.mxu1 %v3026_v1  ;;  %2808 = vmatprep.mubr.msk.f32.mxu0 %vm3027_vm0, %v3026_v1 }
 0x6c6   :  { %2804 = vmatmul.mubr.msk.f32.vlgmr.msra.gmra.mxu1 %vm213_vm2, %v1254_v30 }
 0x6c7   :  { %2813 = vmatprep.mubr.msk.f32.mxu1 %vm3027_vm0, %v3026_v1 }
 0x77e   :  { %v1096_v33 = vpop.f32.mrf.mxu0 }
 0x77f   :  { %v3263_v34 = vadd.f32 %v1096_v33, %v693_v32 }
 0x780   :  { %v2790_v35 = vpop.f32.mrf.mxu0 }
 0x782   :  { %v1169_v37 = vpop.f32.mrf.mxu1  ;;  %v1249_v38 = vpop.f32.mrf.mxu0 }
 0x783   :  { %v3266_v39 = vadd.f32 %v1169_v37, %v694_v36  ;;  %v1331_v40 = vmul.f32 0.35355338, %v1249_v38 }
 0x784   :  { %v2795_v41 = vpop.f32.mrf.mxu1  ;;  %v2800_v42 = vpop.f32.mrf.mxu0 }
 0x785   :  { %v1333_v43 = vsel %vm213_vm2, %v1331_v40, -inf }
 0x786   :  { %v1327_v44 = vpop.f32.mrf.mxu1  ;;  %1334 = vmax.xlane.f32.xlu0 %v1333_v43 }
 0x787   :  { %v1332_v45 = vmul.f32 0.35355338, %v1327_v44 }
 0x788   :  { %v2805_v46 = vpop.f32.mrf.mxu1 }
 0x789   :  { %v1336_v47 = vsel %vm213_vm2, %v1332_v45, -inf }
 0x78a   :  { %1337 = vmax.xlane.f32.xlu1 %v1336_v47 }
 0x79b   :  { %1355 = vrot.lane.b32.xlu1 %v3159_v9, %s3035_s4 }
 0x79f   :  { %1657 = vrot.lane.b32.xlu1 %v3159_v9, %s3036_s15 }
 0x7a3   :  { %1735 = vrot.lane.b32.xlu1 %v3161_v12, %s3036_s15 }
 0x7a7   :  { %1733 = vrot.lane.b32.xlu1 %v3161_v12, %s3037_s16 }
 0x80f   :  { %v1335_v48 = vpop.xlane.xlu0 %1334 }
 0x810   :  { %v1339_v49 = vsub.f32 %v1331_v40, %v1335_v48 }
 0x812   :  { %v1341_v50 = vmul.f32 1.442695, %v1339_v49 }
 0x813   :  { %v1338_v51 = vpop.xlane.xlu1 %1337 }
 0x814   :  { %2980 = vpow2.f32 %v1341_v50  ;;  %v1340_v52 = vsub.f32 %v1332_v45, %v1338_v51 }
 0x816   :  { %v1343_v53 = vmul.f32 1.442695, %v1340_v52 }
 0x817   :  { %v1356_v54 = vpop.permute.xlu1 %1355 }
 0x818   :  { %2982 = vpow2.f32 %v1343_v53  ;;  %2807 = vmatpush3.msra.mxu0 %v1356_v54 }
 0x819   :  { %2816 = vmatprep.subr.mxu0 %v3026_v1 }
 0x81b   :  { %v1658_v4 = vpop.permute.xlu1 %1657 }
 0x81f   :  { %v1736_v8 = vpop.permute.xlu1 %1735 }
 0x821   :  { %v2981_v55 = vpop.eup %2980 }
 0x822   :  { %v1345_v56 = vsel %vm213_vm2, %v2981_v55, 0.0 }
 0x823   :  { %1346 = vadd.xlane.f32.xlu0 %v1345_v56  ;;  %v1734_v15 = vpop.permute.xlu1 %1733 }
 0x825   :  { %v2983_v57 = vpop.eup %2982 }
 0x826   :  { %v1348_v58 = vsel %vm213_vm2, %v2983_v57, 0.0 }
 0x827   :  { %1349 = vadd.xlane.f32.xlu0 %v1348_v58 }
 0x83d   :  { %1431 = vrot.lane.b32.xlu0 %v3161_v12, %s3035_s4 }
 0x841   :  { %1655 = vrot.lane.b32.xlu0 %v3159_v9, %s3037_s16 }
 0x8ac   :  { %v1347_v59 = vpop.xlane.xlu0 %1346 }
 0x8ad   :  { %2984 = vrcp.f32 %v1347_v59 }
 0x8b0   :  { %v1350_v60 = vpop.xlane.xlu0 %1349 }
 0x8b1   :  { %2986 = vrcp.f32 %v1350_v60 }
 0x8b4   :  { %v1432_v61 = vpop.permute.xlu0 %1431 }
 0x8b5   :  { %2812 = vmatpush3.msra.mxu1 %v1432_v61 }
 0x8b6   :  { %2821 = vmatprep.subr.mxu1 %v3026_v1 }
 0x8b8   :  { %v1656_v11 = vpop.permute.xlu0 %1655 }
 0x8ba   :  { %v2985_v62 = vpop.eup %2984 }
 0x8bb   :  { %v1352_v63 = vmul.f32 %v2985_v62, %v2981_v55 }
 0x8bd   :  { %2809 = vmatmul.mubr.msk.f32.vlgmr.msra.gmra.mxu0 %vm213_vm2, %v1352_v63 }
 0x8be   :  { %v2987_v2 = vpop.eup %2986  ;;  %2817 = vmatpush3.msra.mxu0 %v207_v0  ;;  %2818 = vmatprep.mubr.msk.f32.mxu0 %vm3027_vm0, %v3026_v1 }
 0x8bf   :  { %v1354_v3 = vmul.f32 %v2987_v2, %v2983_v57  ;;  %2826 = vmatprep.subr.mxu0 %v3026_v1 }
 0x8c1   :  { %2814 = vmatmul.mubr.msk.f32.vlgmr.msra.gmra.mxu1 %vm213_vm2, %v1354_v3 }
 0x8c2   :  { %2822 = vmatpush3.msra.mxu1 %v207_v0  ;;  %2823 = vmatprep.mubr.msk.f32.mxu1 %vm3027_vm0, %v3026_v1 }
 0x8c3   :  { %2831 = vmatprep.subr.mxu1 %v3026_v1 }
 0x97d   :  { %v1427_v7 = vpop.f32.mrf.mxu0 }
 0x97e   :  { %2819 = vmatmul.mubr.msk.f32.vlgmr.msra.gmra.mxu0 %vm213_vm2, %v1427_v7 }
 0x97f   :  { %2827 = vmatpush3.xpose.msk.msra.mxu0 %vm213_vm2, %v1658_v4  ;;  %v2810_v10 = vpop.f32.mrf.mxu0  ;;  %2828 = vmatprep.mubr.msk.f32.mxu0 %vm3027_vm0, %v3026_v1 }
 0x980   :  { %2836 = vmatprep.subr.mxu0 %v3026_v1  ;;  %v2184_v10 = vld [vmem:[%s3492_s7 + $0x10] sm:$0xff] }
 0x981   :  { %v1503_v13 = vpop.f32.mrf.mxu1 }
 0x982   :  { %2824 = vmatmul.mubr.msk.f32.vlgmr.msra.gmra.mxu1 %vm213_vm2, %v1503_v13  ;;  %2829 = vmatmul.mubr.msk.f32.vlgmr.msra.gmra.mxu0 %vm213_vm2, %v1656_v11  ;;  %v2183_v11 = vld [vmem:[%s3492_s7 + $0x8] sm:$0xff]  ;;  %v2182_v13 = vld [vmem:[%s3492_s7] sm:$0xff] }
 0x983   :  { %2832 = vmatpush3.xpose.msk.msra.mxu1 %vm213_vm2, %v1736_v8  ;;  %v2815_v14 = vpop.f32.mrf.mxu1  ;;  %2833 = vmatprep.mubr.msk.f32.mxu1 %vm3027_vm0, %v3026_v1 }
 0x984   :  { %2841 = vmatprep.subr.mxu1 %v3026_v1  ;;  %2838 = vmatprep.mubr.msk.f32.mxu0 %vm3027_vm0, %v3026_v1 }
 0x986   :  { %2834 = vmatmul.mubr.msk.f32.vlgmr.msra.gmra.mxu1 %vm213_vm2, %v1734_v15 }
 0x987   :  { %2843 = vmatprep.mubr.msk.f32.mxu1 %vm3027_vm0, %v3026_v1 }
 0xa3e   :  { %v1576_v16 = vpop.f32.mrf.mxu0 }
 0xa3f   :  { %v3308_v17 = vadd.f32 %v1576_v16, %v3263_v34 }
 0xa40   :  { %v2820_v18 = vpop.f32.mrf.mxu0 }
 0xa42   :  { %v1649_v19 = vpop.f32.mrf.mxu1  ;;  %v1729_v20 = vpop.f32.mrf.mxu0 }
 0xa43   :  { %v3311_v21 = vadd.f32 %v1649_v19, %v3266_v39  ;;  %v1811_v22 = vmul.f32 0.35355338, %v1729_v20 }
 0xa44   :  { %v2825_v23 = vpop.f32.mrf.mxu1  ;;  %v2830_v24 = vpop.f32.mrf.mxu0 }
 0xa45   :  { %v1813_v25 = vsel %vm213_vm2, %v1811_v22, -inf  ;;  %v2605_v23 = vld [vmem:[%s3491_s6] ss:$0 sm:$0xff] }
 0xa46   :  { %v1807_v26 = vpop.f32.mrf.mxu1  ;;  %1814 = vmax.xlane.f32.xlu0 %v1813_v25 }
 0xa47   :  { %v1812_v27 = vmul.f32 0.35355338, %v1807_v26 }
 0xa48   :  { %v2835_v28 = vpop.f32.mrf.mxu1 }
 0xa49   :  { %v1816_v29 = vsel %vm213_vm2, %v1812_v27, -inf  ;;  %v2356_v28 = vld [vmem:[%s3494_s9 + $0x78] sm:$0xff] }
 0xa4a   :  { %1817 = vmax.xlane.f32.xlu1 %v1816_v29 }
 0xa5b   :  { %1835 = vrot.lane.b32.xlu1 %v3159_v9, %s3038_s19 }
 0xacf   :  { %v1815_v30 = vpop.xlane.xlu0 %1814 }
 0xad0   :  { %v1819_v31 = vsub.f32 %v1811_v22, %v1815_v30  ;;  %v2355_v30 = vld [vmem:[%s3494_s9 + $0x70] sm:$0xff] }
 0xad2   :  { %v1821_v32 = vmul.f32 1.442695, %v1819_v31 }
 0xad3   :  { %v1818_v33 = vpop.xlane.xlu1 %1817 }
 0xad4   :  { %2988 = vpow2.f32 %v1821_v32  ;;  %v1820_v34 = vsub.f32 %v1812_v27, %v1818_v33  ;;  %v2354_v32 = vld [vmem:[%s3494_s9 + $0x68] sm:$0xff]  ;;  %v2353_v33 = vld [vmem:[%s3494_s9 + $0x60] sm:$0xff] }
 0xad6   :  { %v1823_v35 = vmul.f32 1.442695, %v1820_v34  ;;  %v2352_v34 = vld [vmem:[%s3494_s9 + $0x58] sm:$0xff] }
 0xad7   :  { %v1836_v36 = vpop.permute.xlu1 %1835 }
 0xad8   :  { %2990 = vpow2.f32 %v1823_v35  ;;  %2837 = vmatpush3.msra.mxu0 %v1836_v36  ;;  %v2351_v35 = vld [vmem:[%s3494_s9 + $0x50] sm:$0xff]  ;;  %v2350_v36 = vld [vmem:[%s3494_s9 + $0x48] sm:$0xff] }
 0xad9   :  { %2846 = vmatprep.subr.mxu0 %v3026_v1 }
 0xae1   :  { %v2989_v37 = vpop.eup %2988 }
 0xae2   :  { %v1825_v38 = vsel %vm213_vm2, %v2989_v37, 0.0 }
 0xae3   :  { %1826 = vadd.xlane.f32.xlu0 %v1825_v38  ;;  %v2348_v38 = vld [vmem:[%s3494_s9 + $0x38] sm:$0xff] }
 0xae5   :  { %v2991_v39 = vpop.eup %2990 }
 0xae6   :  { %v1828_v40 = vsel %vm213_vm2, %v2991_v39, 0.0 }
 0xae7   :  { %1829 = vadd.xlane.f32.xlu0 %v1828_v40  ;;  %v2346_v40 = vld [vmem:[%s3494_s9 + $0x28] sm:$0xff] }
 0xafd   :  { %1911 = vrot.lane.b32.xlu0 %v3161_v12, %s3038_s19  ;;  %v208_v12 = vld [vmem:[%s3488_s3 + $0x18] sm:$0xff]  ;;  %s2557_s3 = sshll.u32 %s3039_s1, 4  ;;  %s2558_s3 = int_to_ptr.vmem [resolvable:$true] %s2557_s3 }
 0xafe   :  { %s3004_s20 = scalar_lea.vmem %s2558_s3, 256  ;;  %p3009_p1 = scmp.lt.s32.totalorder %s2558_s3, %s2558_s3 }
 0xaff   :  { %p3005_p0 = scmp.ne.s32.totalorder %s2558_s3, %s3004_s20  ;;  %p3010_p2 = scmp.lt.s32.totalorder %s3004_s20, %s3004_s20 }
 0xb01   :  { %p3011_p3 = por %p3010_p2, %p3009_p1 }
 0xb03   :  { %p3012_p4 = pnand %p3011_p3, %p3005_p0 }
 0xb6c   :  { %v1827_v9 = vpop.xlane.xlu0 %1826 }
 0xb6d   :  { %2992 = vrcp.f32 %v1827_v9  ;;  %v2345_v9 = vld [vmem:[%s3494_s9 + $0x20] sm:$0xff] }
 0xb70   :  { %v1830_v41 = vpop.xlane.xlu0 %1829 }
 0xb71   :  { %2994 = vrcp.f32 %v1830_v41  ;;  %v2344_v41 = vld [vmem:[%s3494_s9 + $0x18] sm:$0xff] }
 0xb74   :  { %v1912_v42 = vpop.permute.xlu0 %1911 }
 0xb75   :  { %2842 = vmatpush3.msra.mxu1 %v1912_v42  ;;  %v2343_v42 = vld [vmem:[%s3494_s9 + $0x10] sm:$0xff] }
 0xb76   :  { %2851 = vmatprep.subr.mxu1 %v3026_v1 }
 0xb7a   :  { %v2993_v43 = vpop.eup %2992 }
 0xb7b   :  { %v1832_v44 = vmul.f32 %v2993_v43, %v2989_v37  ;;  %v2349_v37 = vld [vmem:[%s3494_s9 + $0x40] sm:$0xff]  ;;  %v2342_v43 = vld [vmem:[%s3494_s9 + $0x8] sm:$0xff] }
 0xb7d   :  { %2839 = vmatmul.mubr.msk.f32.vlgmr.msra.gmra.mxu0 %vm213_vm2, %v1832_v44  ;;  %v2341_v44 = vld [vmem:[%s3494_s9] sm:$0xff] }
 0xb7e   :  { %v2995_v45 = vpop.eup %2994  ;;  %2848 = vmatprep.mubr.msk.f32.mxu0 %vm3027_vm0, %v3026_v1  ;;  %2847 = vmatpush3.msra.mxu0 %v208_v12 }
 0xb7f   :  { %v1834_v46 = vmul.f32 %v2995_v45, %v2991_v39  ;;  %2856 = vmatprep.subr.mxu0 %v3026_v1  ;;  %v2347_v39 = vld [vmem:[%s3494_s9 + $0x30] sm:$0xff]  ;;  %v2606_v45 = vld [vmem:[%s3493_s8] ss:$0 sm:$0xff] }
 0xb81   :  { %2844 = vmatmul.mubr.msk.f32.vlgmr.msra.gmra.mxu1 %vm213_vm2, %v1834_v46 }
 0xb82   :  { %2853 = vmatprep.mubr.msk.f32.mxu1 %vm3027_vm0, %v3026_v1  ;;  %2852 = vmatpush3.msra.mxu1 %v208_v12 }
 0xb83   :  { %2867 = vmatprep.subr.mxu1 %v3026_v1 }
 0xc3d   :  { %v1907_v47 = vpop.f32.mrf.mxu0 }
 0xc3e   :  { %2849 = vmatmul.mubr.msk.f32.vlgmr.msra.gmra.mxu0 %vm213_vm2, %v1907_v47 }
 0xc3f   :  { %v2840_v48 = vpop.f32.mrf.mxu0  ;;  %2864 = vmatprep.mubr.msk.f32.mxu0 %vm3027_vm0, %v3026_v1 }
 0xc41   :  { %v1983_v49 = vpop.f32.mrf.mxu1 }
 0xc42   :  { %2854 = vmatmul.mubr.msk.f32.vlgmr.msra.gmra.mxu1 %vm213_vm2, %v1983_v49 }
 0xc43   :  { %v2845_v50 = vpop.f32.mrf.mxu1  ;;  %2875 = vmatprep.mubr.msk.f32.mxu1 %vm3027_vm0, %v3026_v1 }
 0xcfe   :  { %v2056_v51 = vpop.f32.mrf.mxu0 }
 0xcff   :  { %v2133_v52 = vadd.f32 %v2056_v51, %v3308_v17 }
 0xd00   :  { %v2850_v53 = vpop.f32.mrf.mxu0 }
 0xd01   :  { %v2135_v54 = vadd.f32 %v2133_v52, %v3135_v5 }
 0xd02   :  { %v2129_v55 = vpop.f32.mrf.mxu1 }
 0xd03   :  { %v2134_v56 = vadd.f32 %v2129_v55, %v3311_v21  ;;  %v2139_v57 = vsel %vm58_vm1, %v2135_v54, 0.0  ;;  %v2604_v21 = vld [vmem:[%s3490_s5] ss:$0 sm:$0xff] }
 0xd04   :  { %v2855_v58 = vpop.f32.mrf.mxu1  ;;  %2140 = vadd.xlane.f32.xlu1 %v2139_v57 }
 0xd05   :  { %v2136_v59 = vadd.f32 %v2134_v56, %v3142_v6  ;;  %v2185_v6 = vld [vmem:[%s3492_s7 + $0x18] sm:$0xff] }
 0xd06   :  { %2857 = vmatpush3.msra.mxu0 %v2185_v6  ;;  %2868 = vmatpush3.msra.mxu1 %v2185_v6 }
 0xd07   :  { %v2142_v60 = vsel %vm58_vm1, %v2136_v59, 0.0  ;;  %2858 = vmatprep.subr.mxu0 %v3026_v1  ;;  %2869 = vmatprep.subr.mxu1 %v3026_v1 }
 0xd08   :  { %2143 = vadd.xlane.f32.xlu0 %v2142_v60  ;;  %2859 = vmatpush3.msra.mxu0 %v2184_v10 }
 0xd09   :  { %2870 = vmatpush3.msra.mxu1 %v2184_v10  ;;  %2860 = vmatprep.subr.mxu0 %v3026_v1 }
 0xd0a   :  { %2871 = vmatprep.subr.mxu1 %v3026_v1  ;;  %2861 = vmatpush3.msra.mxu0 %v2183_v11 }
 0xd0b   :  { %2872 = vmatpush3.msra.mxu1 %v2183_v11  ;;  %2862 = vmatprep.subr.mxu0 %v3026_v1 }
 0xd0c   :  { %2873 = vmatprep.subr.mxu1 %v3026_v1  ;;  %2863 = vmatpush3.msra.mxu0 %v2182_v13 }
 0xd0d   :  { %2874 = vmatpush3.msra.mxu1 %v2182_v13  ;;  %2878 = vmatprep.subr.mxu0 %v3026_v1 }
 0xd0e   :  { %2913 = vmatprep.subr.mxu1 %v3026_v1 }
 0xd8d   :  { %v2141_v61 = vpop.xlane.xlu1 %2140 }
 0xd8e   :  { %v2146_v62 = vmul.f32 0.03125, %v2141_v61 }
 0xd90   :  { %v2148_v63 = vsub.f32 %v2135_v54, %v2146_v62 }
 0xd91   :  { %v2144_v0 = vpop.xlane.xlu0 %2143 }
 0xd92   :  { %v2147_v2 = vmul.f32 0.03125, %v2144_v0  ;;  %v2150_v3 = vmul.f32 %v2148_v63, %v2148_v63 }
 0xd94   :  { %v2149_v4 = vsub.f32 %v2136_v59, %v2147_v2  ;;  %v2152_v5 = vsel %vm58_vm1, %v2150_v3, 0.0 }
 0xd95   :  { %2153 = vadd.xlane.f32.xlu1 %v2152_v5 }
 0xd96   :  { %v2151_v7 = vmul.f32 %v2149_v4, %v2149_v4 }
 0xd98   :  { %v2155_v8 = vsel %vm58_vm1, %v2151_v7, 0.0 }
 0xd99   :  { %2156 = vadd.xlane.f32.xlu0 %v2155_v8 }
 0xe1e   :  { %v2154_v14 = vpop.xlane.xlu1 %2153 }
 0xe1f   :  { %v2158_v15 = vmul.f32 0.03125, %v2154_v14 }
 0xe21   :  { %v2160_v16 = vadd.f32 1e-05, %v2158_v15 }
 0xe22   :  { %v2157_v17 = vpop.xlane.xlu0 %2156 }
 0xe23   :  { %2996 = vrsqrt.f32 %v2160_v16  ;;  %v2159_v18 = vmul.f32 0.03125, %v2157_v17 }
 0xe25   :  { %v2161_v19 = vadd.f32 1e-05, %v2159_v18 }
 0xe27   :  { %2998 = vrsqrt.f32 %v2161_v19  ;;  %v2610_v19 = vld [vmem:[%s3496_s11] ss:$0 sm:$0xff] }
 0xe30   :  { %v2997_v20 = vpop.eup %2996 }
 0xe31   :  { %v2164_v22 = vmul.f32 %v2997_v20, %v2148_v63 }
 0xe33   :  { %v2172_v24 = vmul.f32 %v2604_v21, %v2164_v22 }
 0xe34   :  { %v2999_v25 = vpop.eup %2998 }
 0xe35   :  { %v2165_v26 = vmul.f32 %v2999_v25, %v2149_v4  ;;  %v3372_v27 = vadd.f32 %v2605_v23, %v2172_v24 }
 0xe37   :  { %2865 = vmatmul.mubr.msk.f32.vlgmr.msra.gmra.mxu0 %vm58_vm1, %v3372_v27  ;;  %v2173_v29 = vmul.f32 %v2604_v21, %v2165_v26  ;;  %v2611_v21 = vld [vmem:[%s3497_s12] ss:$0 sm:$0xff] }
 0xe38   :  { %2879 = vmatpush3.msra.mxu0 %v2356_v28  ;;  %2910 = vmatprep.mubr.msk.f32.mxu0 %vm3027_vm0, %v3026_v1 }
 0xe39   :  { %v3384_v31 = vadd.f32 %v2605_v23, %v2173_v29  ;;  %2880 = vmatprep.subr.mxu0 %v3026_v1 }
 0xe3a   :  { %2881 = vmatpush3.msra.mxu0 %v2355_v30 }
 0xe3b   :  { %2876 = vmatmul.mubr.msk.f32.vlgmr.msra.gmra.mxu1 %vm58_vm1, %v3384_v31  ;;  %2882 = vmatprep.subr.mxu0 %v3026_v1 }
 0xe3c   :  { %2883 = vmatpush3.msra.mxu0 %v2354_v32  ;;  %2914 = vmatpush3.msra.mxu1 %v2356_v28 }
 0xe3d   :  { %2884 = vmatprep.subr.mxu0 %v3026_v1  ;;  %2915 = vmatprep.subr.mxu1 %v3026_v1 }
 0xe3e   :  { %2885 = vmatpush3.msra.mxu0 %v2353_v33  ;;  %2916 = vmatpush3.msra.mxu1 %v2355_v30 }
 0xe3f   :  { %2886 = vmatprep.subr.mxu0 %v3026_v1  ;;  %2917 = vmatprep.subr.mxu1 %v3026_v1 }
 0xe40   :  { %2887 = vmatpush3.msra.mxu0 %v2352_v34  ;;  %2918 = vmatpush3.msra.mxu1 %v2354_v32 }
 0xe41   :  { %2888 = vmatprep.subr.mxu0 %v3026_v1  ;;  %2919 = vmatprep.subr.mxu1 %v3026_v1 }
 0xe42   :  { %2889 = vmatpush3.msra.mxu0 %v2351_v35  ;;  %2920 = vmatpush3.msra.mxu1 %v2353_v33 }
 0xe43   :  { %2890 = vmatprep.subr.mxu0 %v3026_v1  ;;  %2921 = vmatprep.subr.mxu1 %v3026_v1 }
 0xe44   :  { %2891 = vmatpush3.msra.mxu0 %v2350_v36  ;;  %2922 = vmatpush3.msra.mxu1 %v2352_v34 }
 0xe45   :  { %2892 = vmatprep.subr.mxu0 %v3026_v1  ;;  %2923 = vmatprep.subr.mxu1 %v3026_v1 }
 0xe46   :  { %2893 = vmatpush3.msra.mxu0 %v2349_v37  ;;  %2924 = vmatpush3.msra.mxu1 %v2351_v35 }
 0xe47   :  { %2894 = vmatprep.subr.mxu0 %v3026_v1  ;;  %2925 = vmatprep.subr.mxu1 %v3026_v1 }
 0xe48   :  { %2895 = vmatpush3.msra.mxu0 %v2348_v38  ;;  %2926 = vmatpush3.msra.mxu1 %v2350_v36 }
 0xe49   :  { %2896 = vmatprep.subr.mxu0 %v3026_v1  ;;  %2927 = vmatprep.subr.mxu1 %v3026_v1 }
 0xe4a   :  { %2897 = vmatpush3.msra.mxu0 %v2347_v39  ;;  %2928 = vmatpush3.msra.mxu1 %v2349_v37 }
 0xe4b   :  { %2898 = vmatprep.subr.mxu0 %v3026_v1  ;;  %2929 = vmatprep.subr.mxu1 %v3026_v1 }
 0xe4c   :  { %2899 = vmatpush3.msra.mxu0 %v2346_v40  ;;  %2930 = vmatpush3.msra.mxu1 %v2348_v38 }
 0xe4d   :  { %2900 = vmatprep.subr.mxu0 %v3026_v1  ;;  %2931 = vmatprep.subr.mxu1 %v3026_v1 }
 0xe4e   :  { %2901 = vmatpush3.msra.mxu0 %v2345_v9  ;;  %2932 = vmatpush3.msra.mxu1 %v2347_v39 }
 0xe4f   :  { %2902 = vmatprep.subr.mxu0 %v3026_v1  ;;  %2933 = vmatprep.subr.mxu1 %v3026_v1 }
 0xe50   :  { %2903 = vmatpush3.msra.mxu0 %v2344_v41  ;;  %2934 = vmatpush3.msra.mxu1 %v2346_v40 }
 0xe51   :  { %2904 = vmatprep.subr.mxu0 %v3026_v1  ;;  %2935 = vmatprep.subr.mxu1 %v3026_v1 }
 0xe52   :  { %2936 = vmatpush3.msra.mxu1 %v2345_v9  ;;  %2945 = vmatprep.mubr.msk.f32.mxu1 %vm3027_vm0, %v3026_v1 }
 0xe53   :  { %2937 = vmatprep.subr.mxu1 %v3026_v1  ;;  %2905 = vmatpush3.msra.mxu0 %v2343_v42 }
 0xe54   :  { %2938 = vmatpush3.msra.mxu1 %v2344_v41  ;;  %2906 = vmatprep.subr.mxu0 %v3026_v1 }
 0xe55   :  { %2939 = vmatprep.subr.mxu1 %v3026_v1  ;;  %2907 = vmatpush3.msra.mxu0 %v2342_v43 }
 0xe56   :  { %2940 = vmatpush3.msra.mxu1 %v2343_v42  ;;  %2908 = vmatprep.subr.mxu0 %v3026_v1 }
 0xe57   :  { %2941 = vmatprep.subr.mxu1 %v3026_v1  ;;  %2909 = vmatpush3.msra.mxu0 %v2341_v44 }
 0xe58   :  { %2942 = vmatpush3.msra.mxu1 %v2342_v43 }
 0xe59   :  { %2943 = vmatprep.subr.mxu1 %v3026_v1  ;;  %v2609_v1 = vld [vmem:[%s3495_s10] ss:$0 sm:$0xff] }
 0xe5a   :  { %2944 = vmatpush3.msra.mxu1 %v2341_v44 }
 0xef7   :  { %v2262_v46 = vpop.f32.mrf.mxu0 }
 0xef8   :  { %v2263_v12 = vadd.f32 %v2606_v45, %v2262_v46 }
 0xef9   :  { %v2866_v47 = vpop.f32.mrf.mxu0 }
 0xefa   :  { %v2339_v48 = vmax.f32 %v2263_v12, 0.0 }
 0xefb   :  { %v2335_v49 = vpop.f32.mrf.mxu1 }
 0xefc   :  { %v2336_v50 = vadd.f32 %v2606_v45, %v2335_v49  ;;  %2911 = vmatmul.mubr.f32.vlgmr.msra.gmra.mxu0 %v2339_v48 }
 0xefd   :  { %v2877_v51 = vpop.f32.mrf.mxu1 }
 0xefe   :  { %v2340_v52 = vmax.f32 %v2336_v50, 0.0 }
 0xf00   :  { %2946 = vmatmul.mubr.f32.vlgmr.msra.gmra.mxu1 %v2340_v52 }
 0xfbc   :  { %v2430_v53 = vpop.f32.mrf.mxu0 }
 0xfbd   :  { %v2431_v54 = vadd.f32 %v2609_v1, %v2430_v53 }
 0xfbe   :  { %v2912_v55 = vpop.f32.mrf.mxu0 }
 0xfbf   :  { %v2504_v56 = vadd.f32 %v2431_v54, %v3372_v27 }
 0xfc0   :  { %v2500_v57 = vpop.f32.mrf.mxu1 }
 0xfc1   :  { %v2501_v58 = vadd.f32 %v2609_v1, %v2500_v57  ;;  %v2508_v59 = vsel %vm58_vm1, %v2504_v56, 0.0 }
 0xfc2   :  { %v2947_v60 = vpop.f32.mrf.mxu1  ;;  %2509 = vadd.xlane.f32.xlu1 %v2508_v59 }
 0xfc3   :  { %v2505_v61 = vadd.f32 %v2501_v58, %v3384_v31 }
 0xfc5   :  { %v2511_v62 = vsel %vm58_vm1, %v2505_v61, 0.0 }
 0xfc6   :  { %2512 = vadd.xlane.f32.xlu0 %v2511_v62 }
0x104b   :  { %v2510_v63 = vpop.xlane.xlu1 %2509 }
0x104c   :  { %v2514_v0 = vmul.f32 0.03125, %v2510_v63 }
0x104e   :  { %v2516_v2 = vsub.f32 %v2504_v56, %v2514_v0 }
0x104f   :  { %v2513_v3 = vpop.xlane.xlu0 %2512 }
0x1050   :  { %v2515_v4 = vmul.f32 0.03125, %v2513_v3  ;;  %v2518_v5 = vmul.f32 %v2516_v2, %v2516_v2 }
0x1052   :  { %v2517_v7 = vsub.f32 %v2505_v61, %v2515_v4  ;;  %v2520_v8 = vsel %vm58_vm1, %v2518_v5, 0.0 }
0x1053   :  { %2521 = vadd.xlane.f32.xlu1 %v2520_v8 }
0x1054   :  { %v2519_v6 = vmul.f32 %v2517_v7, %v2517_v7 }
0x1056   :  { %v2523_v10 = vsel %vm58_vm1, %v2519_v6, 0.0 }
0x1057   :  { %2524 = vadd.xlane.f32.xlu0 %v2523_v10 }
0x10dc   :  { %v2522_v11 = vpop.xlane.xlu1 %2521 }
0x10dd   :  { %v2526_v13 = vmul.f32 0.03125, %v2522_v11 }
0x10df   :  { %v2528_v14 = vadd.f32 1e-05, %v2526_v13 }
0x10e0   :  { %v2525_v15 = vpop.xlane.xlu0 %2524 }
0x10e1   :  { %3000 = vrsqrt.f32 %v2528_v14  ;;  %v2527_v16 = vmul.f32 0.03125, %v2525_v15 }
0x10e3   :  { %v2529_v17 = vadd.f32 1e-05, %v2527_v16 }
0x10e5   :  { %3002 = vrsqrt.f32 %v2529_v17 }
0x10ee   :  { %v3001_v18 = vpop.eup %3000 }
0x10ef   :  { %v2532_v20 = vmul.f32 %v3001_v18, %v2516_v2 }
0x10f1   :  { %v2540_v22 = vmul.f32 %v2610_v19, %v2532_v20 }
0x10f2   :  { %v3003_v23 = vpop.eup %3002 }
0x10f3   :  { %v2533_v24 = vmul.f32 %v3003_v23, %v2517_v7  ;;  %v2548_v25 = vadd.f32 %v2611_v21, %v2540_v22 }
0x10f5   :  { %v2541_v26 = vmul.f32 %v2610_v19, %v2533_v24  ;;  %2550 = vst.msk [vmem:[#allocation2] sm:$0xff] %vm58_vm1, %v2548_v25 }
0x10f7   :  { %v2549_v27 = vadd.f32 %v2611_v21, %v2541_v26 }
0x10f9   :  { %2551 = vst.msk [vmem:[#allocation2 + $0x8] sm:$0xff] %vm58_vm1, %v2549_v27 }
0x10fa   :  { %3015 = shalt.err (!%p3012_p4)
}
0x10fb   :  { %s3040_s11 = smov 128   ;;  %s3041_s12 = smov 8  }
0x10fc   :  { %2563 = dma.vmem_to_hbm [thread:$0]  %s2558_s3, 256, %s3498_s13, [#allocation3], %s3040_s11, %s3040_s11, %s3041_s12  }
0x10fd   :  { %3024 = dma.done.wait [#allocation3], 256  }
0x10fe   :  { %3025 = vsyncadd [#allocation3], 4294967040 }
0x10ff   :  { %2567 = vsyncpa [#allocation3], 1 }

</bundles_post_ra>
